<compile_context>
chip_gen: v7x
topology: tpu7x:2x2x1
jax: 0.10.0
libtpu: 0.0.40
codegen_flags: <defaults>
</compile_context>

<pallas_src>
import itertools

import numpy as np
import jax
import jax.numpy as jnp
from jax.experimental import pallas as pl
from jax.experimental.pallas import tpu as pltpu

EPS = 1e-5  # nn.BatchNorm1d default


# ----------------------------- Pallas kernels ------------------------------ #

def _deconv_stats_kernel(n_ref, gt_ref, w2t_ref, gamma_ref, beta_ref,
                         y_ref, scale_ref, shift_ref, sum_ref, sq_ref):
    """Phase 1 (per tile): Y^T tile = W2^T @ G^T tile (MXU, bf16 in / f32 acc), streamed
    to HBM; partial BN sums accumulated in VMEM scratch; last tile emits scale/shift."""
    i = pl.program_id(0)

    @pl.when(i == 0)
    def _():
        sum_ref[...] = jnp.zeros_like(sum_ref)
        sq_ref[...] = jnp.zeros_like(sq_ref)

    # sparse deconv GEMM for this column tile: (Cout, Kc) @ (Kc, tn) -> (Cout, tn)
    y = jnp.dot(w2t_ref[...], gt_ref[...], preferred_element_type=jnp.float32)
    y_ref[...] = y  # pipelined (streamed) store of the pre-BN tile

    # partial BN statistics while y is still live in vregs.  Padded tail columns are
    # exact zeros (zero-padded G^T), so plain sums are correct; divide by true N later.
    sum_ref[...] += jnp.sum(y, axis=1, keepdims=True)      # (Cout, 1)
    sq_ref[...] += jnp.sum(y * y, axis=1, keepdims=True)   # (Cout, 1)

    @pl.when(i == pl.num_programs(0) - 1)
    def _():
        n_f = n_ref[0].astype(jnp.float32)                  # true point count, from SMEM
        mean = sum_ref[...] / n_f
        var = jnp.maximum(sq_ref[...] / n_f - mean * mean, 0.0)
        inv = jax.lax.rsqrt(var + EPS)
        scale = gamma_ref[...] * inv                        # (Cout, 1)
        scale_ref[...] = scale
        shift_ref[...] = beta_ref[...] - mean * scale


def _bn_relu_apply_kernel(y_ref, scale_ref, shift_ref, o_ref):
    """Phase 2 (per tile): streaming BN affine + ReLU, full-lane loads/stores."""
    o_ref[...] = jnp.maximum(y_ref[...] * scale_ref[...] + shift_ref[...], 0.0)


# ------------------------------- glue (host) ------------------------------- #

def build_kernel_map(coords_np, ks, D):
    """nbr[k, i] = index j of input point with C[j] == C[i] - offset_k, else -1.
    Vectorized numpy (radix packing + sort + searchsorted), no Python dict loops."""
    offsets = np.array(
        list(itertools.product(range(-(ks // 2), ks // 2 + 1), repeat=D)),
        dtype=np.int64,
    )                                                           # (K, D) hyper-cube region
    K = offsets.shape[0]
    c = coords_np.astype(np.int64)                              # (N, 1+D)
    N = c.shape[0]
    off_full = np.concatenate([np.zeros((K, 1), np.int64), offsets], axis=1)  # batch not offset
    queries = c[None, :, :] - off_full[:, None, :]              # (K, N, 1+D)

    qflat = queries.reshape(-1, c.shape[1])
    lo = np.minimum(c.min(axis=0), qflat.min(axis=0))
    hi = np.maximum(c.max(axis=0), qflat.max(axis=0))
    radix = (hi - lo + 1).astype(np.int64)

    def pack(x):
        key = np.zeros(x.shape[:-1], dtype=np.int64)
        for d in range(x.shape[-1]):
            key = key * radix[d] + (x[..., d] - lo[d])
        return key

    ckeys = pack(c)                                             # (N,)
    qkeys = pack(queries)                                       # (K, N)
    order = np.argsort(ckeys, kind="stable")
    skeys = ckeys[order]
    pos = np.searchsorted(skeys, qkeys)
    pos_c = np.minimum(pos, N - 1)
    found = skeys[pos_c] == qkeys
    return np.where(found, order[pos_c], -1).astype(np.int32)   # (K, N)


def gather_features_t(feats, nbr):
    """Apply the kernel map; returns G^T of shape (K*Cin, N) (zero-masked)."""
    K, N = nbr.shape
    mask = nbr >= 0
    safe = jnp.where(mask, nbr, 0)
    g = feats[safe]                                   # (K, N, Cin)
    g = jnp.where(mask[..., None], g, 0.0)
    # flatten so that row index = k * Cin + c (matches W.reshape(K*Cin, Cout))
    return jnp.transpose(g, (0, 2, 1)).reshape(K * feats.shape[1], N)


def basic_deconvolution_block(feats, coords_np, W, gamma, beta, *, ks=3, D=3, tn=2048):
    N, Cin = feats.shape
    K = ks ** D
    Cout = W.shape[-1]
    if N == 0:
        return jnp.zeros((0, Cout), jnp.float32)

    # clamp the tile so tiny inputs don't pad all the way to tn; keep multiple of 128
    tn = min(tn, ((N + 127) // 128) * 128)
    assert tn % 128 == 0

    Kc = K * Cin
    Kc_pad = ((Kc + 127) // 128) * 128                # pad contraction dim to 128
    Cout_pad = ((Cout + 7) // 8) * 8                  # sublane-align output channels
    n_pad = ((N + tn - 1) // tn) * tn
    num_tiles = n_pad // tn

    nbr = build_kernel_map(coords_np, ks, D)
    gt = gather_features_t(feats, jnp.asarray(nbr))                        # (Kc, N)
    gt = jnp.pad(gt, ((0, Kc_pad - Kc), (0, n_pad - N))).astype(jnp.bfloat16)
    w2t = jnp.pad(W.reshape(Kc, Cout).T.astype(jnp.float32),
                  ((0, Cout_pad - Cout), (0, Kc_pad - Kc))).astype(jnp.bfloat16)
    gamma2 = jnp.pad(gamma.reshape(Cout, 1).astype(jnp.float32),
                     ((0, Cout_pad - Cout), (0, 0)))
    beta2 = jnp.pad(beta.reshape(Cout, 1).astype(jnp.float32),
                    ((0, Cout_pad - Cout), (0, 0)))
    n_arr = jnp.array([N], dtype=jnp.int32)

    # explicit VMEM budget (review: document the footprint; safe on v5e/v6e/v7x):
    #   2x G^T tile (bf16, double-buffered) + 2x Y^T tile (f32) + constants/scratch
    vmem_limit = max(2 * Kc_pad * tn * 2 + 2 * Cout_pad * tn * 4 + (2 << 20), 4 << 20)

    # --- phase 1: GEMM (streamed pre-BN output) + partial BN stats ---------------
    y_pre, scale, shift = pl.pallas_call(
        _deconv_stats_kernel,
        out_shape=(jax.ShapeDtypeStruct((Cout_pad, n_pad), jnp.float32),
                   jax.ShapeDtypeStruct((Cout_pad, 1), jnp.float32),
                   jax.ShapeDtypeStruct((Cout_pad, 1), jnp.float32)),
        grid_spec=pltpu.PrefetchScalarGridSpec(
            num_scalar_prefetch=1,
            grid=(num_tiles,),
            in_specs=[
                pl.BlockSpec((Kc_pad, tn), lambda i, n_s: (0, i)),        # G^T column tile
                pl.BlockSpec((Cout_pad, Kc_pad), lambda i, n_s: (0, 0)),  # W2^T (resident)
                pl.BlockSpec((Cout_pad, 1), lambda i, n_s: (0, 0)),       # gamma
                pl.BlockSpec((Cout_pad, 1), lambda i, n_s: (0, 0)),       # beta
            ],
            out_specs=(
                pl.BlockSpec((Cout_pad, tn), lambda i, n_s: (0, i)),      # streamed Y^T tile
                pl.BlockSpec((Cout_pad, 1), lambda i, n_s: (0, 0)),       # scale (resident)
                pl.BlockSpec((Cout_pad, 1), lambda i, n_s: (0, 0)),       # shift (resident)
            ),
            scratch_shapes=[pltpu.VMEM((Cout_pad, 1), jnp.float32),       # sum
                            pltpu.VMEM((Cout_pad, 1), jnp.float32)],      # sum of squares
        ),
        compiler_params=pltpu.CompilerParams(
            dimension_semantics=("arbitrary",),
            vmem_limit_bytes=vmem_limit),
    )(n_arr, gt, w2t, gamma2, beta2)

    # --- phase 2: streaming BN affine + ReLU apply (lane-dense, pipelined) -------
    out_t = pl.pallas_call(
        _bn_relu_apply_kernel,
        out_shape=jax.ShapeDtypeStruct((Cout_pad, n_pad), jnp.float32),
        grid=(num_tiles,),
        in_specs=[
            pl.BlockSpec((Cout_pad, tn), lambda i: (0, i)),
            pl.BlockSpec((Cout_pad, 1), lambda i: (0, 0)),
            pl.BlockSpec((Cout_pad, 1), lambda i: (0, 0)),
        ],
        out_specs=pl.BlockSpec((Cout_pad, tn), lambda i: (0, i)),
        compiler_params=pltpu.CompilerParams(
            dimension_semantics=("parallel",),
            vmem_limit_bytes=vmem_limit),
    )(y_pre, scale, shift)

    # (Cout_pad, n_pad) -> (N, Cout).  Padded tail columns/channels are sliced away.
    return out_t[:Cout, :N].T


# --------------------------------- demo ------------------------------------ #

if __name__ == "__main__":
    ks, stride, D = 3, 1, 3
    inc, outc = 4, 8
    B, pts_per_batch, spatial = 2, 1300, 16

    # deterministic unique sparse coordinates: subsample a 16x16x16 grid per batch
    key = jax.random.PRNGKey(0)
    grid_coords = np.array(list(itertools.product(range(spatial), repeat=3)), dtype=np.int32)
    coords_list = []
    for b in range(B):
        key, sub = jax.random.split(key)
        perm = np.asarray(jax.random.permutation(sub, grid_coords.shape[0]))[:pts_per_batch]
        sel = grid_coords[perm]
        coords_list.append(
            np.concatenate([np.full((pts_per_batch, 1), b, np.int32), sel], axis=1)
        )
    coords = np.concatenate(coords_list, axis=0)        # (2600, 4)
    N = coords.shape[0]

    kf, kw, kg, kb = jax.random.split(key, 4)
    feats = jax.random.normal(kf, (N, inc), jnp.float32)
    K = ks ** D
    W = jax.random.normal(kw, (K, inc, outc), jnp.float32) / np.sqrt(K * inc)
    gamma = 1.0 + 0.1 * jax.random.normal(kg, (outc,), jnp.float32)
    beta = 0.1 * jax.random.normal(kb, (outc,), jnp.float32)

    # N=2600 with tn=2048 -> n_pad=4096, 2 tiles: exercises the partial-stats accumulation
    out = basic_deconvolution_block(feats, coords, W, gamma, beta, ks=ks, D=D, tn=2048)
    out = jax.block_until_ready(out)

    # pure-JAX reference (same bf16-rounded matmul operands as the kernel, f32 accumulation)
    nbr = build_kernel_map(coords, ks, D)
    gt_ref = gather_features_t(feats, jnp.asarray(nbr))
    gt_b = gt_ref.astype(jnp.bfloat16).astype(jnp.float32)                 # (K*inc, N)
    w2t_b = W.reshape(K * inc, outc).T.astype(jnp.bfloat16).astype(jnp.float32)
    y_ref = (w2t_b @ gt_b).T                                               # (N, outc)
    mean = y_ref.mean(axis=0)
    var = ((y_ref - mean) ** 2).mean(axis=0)
    ref = jnp.maximum((y_ref - mean) / jnp.sqrt(var + EPS) * gamma + beta, 0.0)

    np.testing.assert_allclose(np.asarray(out), np.asarray(ref), atol=1e-3, rtol=1e-3)
    print("KERNEL_OK")
</pallas_src>

<mosaic_0001>
module attributes {stable_mosaic.version = 11 : i64} {
  func.func @_deconv_stats_kernel(%arg0: i32, %arg1: memref<1xi32, #tpu.memory_space<smem>>, %arg2: memref<128x2048xbf16, #tpu.memory_space<vmem>>, %arg3: memref<8x128xbf16, #tpu.memory_space<vmem>>, %arg4: memref<8x1xf32, #tpu.memory_space<vmem>>, %arg5: memref<8x1xf32, #tpu.memory_space<vmem>>, %arg6: memref<8x2048xf32, #tpu.memory_space<vmem>>, %arg7: memref<8x1xf32, #tpu.memory_space<vmem>>, %arg8: memref<8x1xf32, #tpu.memory_space<vmem>>, %arg9: memref<8x1xf32, #tpu.memory_space<vmem>>, %arg10: memref<8x1xf32, #tpu.memory_space<vmem>>) attributes {dimension_semantics = [#tpu.dimension_semantics<arbitrary>], iteration_bounds = array<i64: 2>, scalar_prefetch = 1 : i64, scratch_operands = 2 : i64, tpu.core_type = #tpu.core_type<tc>, window_params = [{transform_indices = @transform_0, window_bounds = array<i64: 128, 2048>}, {pipeline_mode = #tpu.pipeline_mode<synchronous>, transform_indices = @transform_1, window_bounds = array<i64: 8, 128>}, {pipeline_mode = #tpu.pipeline_mode<synchronous>, transform_indices = @transform_2, window_bounds = array<i64: 8, 1>}, {pipeline_mode = #tpu.pipeline_mode<synchronous>, transform_indices = @transform_3, window_bounds = array<i64: 8, 1>}, {transform_indices = @transform_4, window_bounds = array<i64: 8, 2048>}, {pipeline_mode = #tpu.pipeline_mode<synchronous>, transform_indices = @transform_5, window_bounds = array<i64: 8, 1>}, {pipeline_mode = #tpu.pipeline_mode<synchronous>, transform_indices = @transform_6, window_bounds = array<i64: 8, 1>}]} {
    %c0_i32 = arith.constant 0 : i32
    %0 = arith.cmpi eq, %arg0, %c0_i32 : i32
    %1 = arith.extui %0 : i1 to i32
    %c0_i32_0 = arith.constant 0 : i32
    %2 = arith.cmpi ne, %1, %c0_i32_0 : i32
    scf.if %2 {
      %cst_17 = arith.constant 0.000000e+00 : f32
      %21 = vector.broadcast %cst_17 : f32 to vector<8x1xf32>
      %c0_18 = arith.constant 0 : index
      %c0_19 = arith.constant 0 : index
      %22 = vector.load %arg9[%c0_18, %c0_19] : memref<8x1xf32, #tpu.memory_space<vmem>>, vector<8x1xf32>
      tpu.vector_store %arg9[%c0_18, %c0_19], %21 {strides = array<i32>} : memref<8x1xf32, #tpu.memory_space<vmem>>, vector<8x1xf32>,
      %cst_20 = arith.constant 0.000000e+00 : f32
      %23 = vector.broadcast %cst_20 : f32 to vector<8x1xf32>
      %c0_21 = arith.constant 0 : index
      %c0_22 = arith.constant 0 : index
      %24 = vector.load %arg10[%c0_21, %c0_22] : memref<8x1xf32, #tpu.memory_space<vmem>>, vector<8x1xf32>
      tpu.vector_store %arg10[%c0_21, %c0_22], %23 {strides = array<i32>} : memref<8x1xf32, #tpu.memory_space<vmem>>, vector<8x1xf32>,
    } else {
    }
    %c0 = arith.constant 0 : index
    %c0_1 = arith.constant 0 : index
    %3 = vector.load %arg3[%c0, %c0_1] : memref<8x128xbf16, #tpu.memory_space<vmem>>, vector<8x128xbf16>
    %c0_2 = arith.constant 0 : index
    %c0_3 = arith.constant 0 : index
    %4 = vector.load %arg2[%c0_2, %c0_3] : memref<128x2048xbf16, #tpu.memory_space<vmem>>, vector<128x2048xbf16>
    %cst = arith.constant dense<0.000000e+00> : vector<8x2048xf32>
    %5 = tpu.matmul %3, %4, %cst {dimension_numbers = #tpu.dot_dimension_numbers<[1], [0], [0], [1], [0, 0, 1, 1], [], []>} : vector<8x128xbf16>, vector<128x2048xbf16>, vector<8x2048xf32> -> vector<8x2048xf32>
    %c0_4 = arith.constant 0 : index
    %c0_5 = arith.constant 0 : index
    %6 = vector.load %arg6[%c0_4, %c0_5] : memref<8x2048xf32, #tpu.memory_space<vmem>>, vector<8x2048xf32>
    tpu.vector_store %arg6[%c0_4, %c0_5], %5 {strides = array<i32>} : memref<8x2048xf32, #tpu.memory_space<vmem>>, vector<8x2048xf32>,
    %c0_6 = arith.constant 0 : index
    %c0_7 = arith.constant 0 : index
    %7 = vector.load %arg9[%c0_6, %c0_7] : memref<8x1xf32, #tpu.memory_space<vmem>>, vector<8x1xf32>
    %cst_8 = arith.constant dense<0.000000e+00> : vector<8xf32>
    %8 = vector.multi_reduction <add>, %5, %cst_8 [1] : vector<8x2048xf32> to vector<8xf32>
    %9 = vector.shape_cast %8 : vector<8xf32> to vector<8x1xf32>
    %10 = arith.addf %7, %9 : vector<8x1xf32>
    %c0_9 = arith.constant 0 : index
    %c0_10 = arith.constant 0 : index
    %11 = vector.load %arg9[%c0_9, %c0_10] : memref<8x1xf32, #tpu.memory_space<vmem>>, vector<8x1xf32>
    tpu.vector_store %arg9[%c0_9, %c0_10], %10 {strides = array<i32>} : memref<8x1xf32, #tpu.memory_space<vmem>>, vector<8x1xf32>,
    %c0_11 = arith.constant 0 : index
    %c0_12 = arith.constant 0 : index
    %12 = vector.load %arg10[%c0_11, %c0_12] : memref<8x1xf32, #tpu.memory_space<vmem>>, vector<8x1xf32>
    %13 = arith.mulf %5, %5 : vector<8x2048xf32>
    %cst_13 = arith.constant dense<0.000000e+00> : vector<8xf32>
    %14 = vector.multi_reduction <add>, %13, %cst_13 [1] : vector<8x2048xf32> to vector<8xf32>
    %15 = vector.shape_cast %14 : vector<8xf32> to vector<8x1xf32>
    %16 = arith.addf %12, %15 : vector<8x1xf32>
    %c0_14 = arith.constant 0 : index
    %c0_15 = arith.constant 0 : index
    %17 = vector.load %arg10[%c0_14, %c0_15] : memref<8x1xf32, #tpu.memory_space<vmem>>, vector<8x1xf32>
    tpu.vector_store %arg10[%c0_14, %c0_15], %16 {strides = array<i32>} : memref<8x1xf32, #tpu.memory_space<vmem>>, vector<8x1xf32>,
    %c1_i32 = arith.constant 1 : i32
    %18 = arith.cmpi eq, %arg0, %c1_i32 : i32
    %19 = arith.extui %18 : i1 to i32
    %c0_i32_16 = arith.constant 0 : i32
    %20 = arith.cmpi ne, %19, %c0_i32_16 : i32
    scf.if %20 {
      %c0_17 = arith.constant 0 : index
      %21 = memref.load %arg1[%c0_17] : memref<1xi32, #tpu.memory_space<smem>>
      %22 = arith.sitofp %21 : i32 to f32
      %c0_18 = arith.constant 0 : index
      %c0_19 = arith.constant 0 : index
      %23 = vector.load %arg9[%c0_18, %c0_19] : memref<8x1xf32, #tpu.memory_space<vmem>>, vector<8x1xf32>
      %24 = vector.broadcast %22 : f32 to vector<8x1xf32>
      %25 = arith.divf %23, %24 : vector<8x1xf32>
      %c0_20 = arith.constant 0 : index
      %c0_21 = arith.constant 0 : index
      %26 = vector.load %arg10[%c0_20, %c0_21] : memref<8x1xf32, #tpu.memory_space<vmem>>, vector<8x1xf32>
      %27 = vector.broadcast %22 : f32 to vector<8x1xf32>
      %28 = arith.divf %26, %27 : vector<8x1xf32>
      %29 = arith.mulf %25, %25 : vector<8x1xf32>
      %30 = arith.subf %28, %29 : vector<8x1xf32>
      %cst_22 = arith.constant 0.000000e+00 : f32
      %31 = vector.broadcast %cst_22 : f32 to vector<8x1xf32>
      %32 = arith.maximumf %30, %31 : vector<8x1xf32>
      %cst_23 = arith.constant 9.99999974E-6 : f32
      %33 = vector.broadcast %cst_23 : f32 to vector<8x1xf32>
      %34 = arith.addf %32, %33 : vector<8x1xf32>
      %35 = math.rsqrt %34 : vector<8x1xf32>
      %c0_24 = arith.constant 0 : index
      %c0_25 = arith.constant 0 : index
      %36 = vector.load %arg4[%c0_24, %c0_25] : memref<8x1xf32, #tpu.memory_space<vmem>>, vector<8x1xf32>
      %37 = arith.mulf %36, %35 : vector<8x1xf32>
      %c0_26 = arith.constant 0 : index
      %c0_27 = arith.constant 0 : index
      %38 = vector.load %arg7[%c0_26, %c0_27] : memref<8x1xf32, #tpu.memory_space<vmem>>, vector<8x1xf32>
      tpu.vector_store %arg7[%c0_26, %c0_27], %37 {strides = array<i32>} : memref<8x1xf32, #tpu.memory_space<vmem>>, vector<8x1xf32>,
      %c0_28 = arith.constant 0 : index
      %c0_29 = arith.constant 0 : index
      %39 = vector.load %arg5[%c0_28, %c0_29] : memref<8x1xf32, #tpu.memory_space<vmem>>, vector<8x1xf32>
      %40 = arith.mulf %25, %37 : vector<8x1xf32>
      %41 = arith.subf %39, %40 : vector<8x1xf32>
      %c0_30 = arith.constant 0 : index
      %c0_31 = arith.constant 0 : index
      %42 = vector.load %arg8[%c0_30, %c0_31] : memref<8x1xf32, #tpu.memory_space<vmem>>, vector<8x1xf32>
      tpu.vector_store %arg8[%c0_30, %c0_31], %41 {strides = array<i32>} : memref<8x1xf32, #tpu.memory_space<vmem>>, vector<8x1xf32>,
    } else {
    }
    return
  }
  func.func @transform_0(%arg0: i32, %arg1: memref<1xi32, #tpu.memory_space<smem>>) -> (i32, i32) {
    %c0_i32 = arith.constant 0 : i32
    %c0_i32_0 = arith.constant 0 : i32
    return %c0_i32, %arg0 : i32, i32
  }
  func.func @transform_1(%arg0: i32, %arg1: memref<1xi32, #tpu.memory_space<smem>>) -> (i32, i32) {
    %c0_i32 = arith.constant 0 : i32
    %c0_i32_0 = arith.constant 0 : i32
    %c0_i32_1 = arith.constant 0 : i32
    return %c0_i32, %c0_i32_0 : i32, i32
  }
  func.func @transform_2(%arg0: i32, %arg1: memref<1xi32, #tpu.memory_space<smem>>) -> (i32, i32) {
    %c0_i32 = arith.constant 0 : i32
    %c0_i32_0 = arith.constant 0 : i32
    %c0_i32_1 = arith.constant 0 : i32
    return %c0_i32, %c0_i32_0 : i32, i32
  }
  func.func @transform_3(%arg0: i32, %arg1: memref<1xi32, #tpu.memory_space<smem>>) -> (i32, i32) {
    %c0_i32 = arith.constant 0 : i32
    %c0_i32_0 = arith.constant 0 : i32
    %c0_i32_1 = arith.constant 0 : i32
    return %c0_i32, %c0_i32_0 : i32, i32
  }
  func.func @transform_4(%arg0: i32, %arg1: memref<1xi32, #tpu.memory_space<smem>>) -> (i32, i32) {
    %c0_i32 = arith.constant 0 : i32
    %c0_i32_0 = arith.constant 0 : i32
    return %c0_i32, %arg0 : i32, i32
  }
  func.func @transform_5(%arg0: i32, %arg1: memref<1xi32, #tpu.memory_space<smem>>) -> (i32, i32) {
    %c0_i32 = arith.constant 0 : i32
    %c0_i32_0 = arith.constant 0 : i32
    %c0_i32_1 = arith.constant 0 : i32
    return %c0_i32, %c0_i32_0 : i32, i32
  }
  func.func @transform_6(%arg0: i32, %arg1: memref<1xi32, #tpu.memory_space<smem>>) -> (i32, i32) {
    %c0_i32 = arith.constant 0 : i32
    %c0_i32_0 = arith.constant 0 : i32
    %c0_i32_1 = arith.constant 0 : i32
    return %c0_i32, %c0_i32_0 : i32, i32
  }
}

</mosaic_0001>

<bundles_post_ra>
// kernel: tpu_custom_call.1
= control target key start
LH: loop header
LB: loop body
LE: loop exit
PB: predicated region body
PF: predicated region fallthrough
CT: control target
= control target key end

     0   :  { %s2262_s0 = inlined_call_operand.<no memory space> [shape: s32[1], index: 0, kind: input, shape index: {}]   ;;  %s2263_s1 = inlined_call_operand.hbm [shape: bf16[128,4096], index: 1, kind: input, shape index: {}]   ;;  %s2264_s2 = inlined_call_operand.vmem [shape: bf16[8,128], index: 2, kind: input, shape index: {}]   ;;  %s2265_s3 = inlined_call_operand.vmem [shape: f32[8,1], index: 3, kind: input, shape index: {}]   ;;  %s2266_s4 = inlined_call_operand.vmem [shape: f32[8,1], index: 4, kind: input, shape index: {}]   ;;  %s2267_s5 = inlined_call_operand.hbm [shape: f32[8,4096], index: 5, kind: output, shape index: {0}]   ;;  %s2268_s6 = inlined_call_operand.vmem [shape: f32[8,1], index: 6, kind: output, shape index: {1}]   ;;  %s2269_s7 = inlined_call_operand.vmem [shape: f32[8,1], index: 7, kind: output, shape index: {2}]  }
   0x1   :  { %13 = sst [smem:[#allocation5]] %s2262_s0 }
   0x2   :  { %14 = vsyncpa [#allocation7], 0 }
   0x3   :  { %16 = vsyncpa [#allocation7 + $0x1], 0 }
   0x4   :  { %17 = vsyncpa [#allocation8], 0 }
   0x5   :  { %19 = vsyncpa [#allocation8 + $0x1], 0  ;;  %s1917_s26 = smov 0   ;;  %s1919_s27 = smov 0  }
   0x6   :  { %s1921_s28 = smov 0   ;;  %s1923_s29 = smov 0  }
   0x7 LB: > { %s1938_s0 = sadd.s32 4294967295, %s1865_s29   ;;  %s1568_s30 = sadd.s32 4294967294, %s1865_s29   ;;  %s1865_s29 = sphi %s1923_s29, %s2283_s29   ;;  %s1861_s28 = sphi %s1921_s28, %s2282_s28   ;;  %s1857_s27 = sphi %s1919_s27, %s2281_s27   ;;  %s1853_s26 = sphi %s1917_s26, %s2280_s26  }
   0x8   : > { %s1942_s8 = sadd.s32 1, %s1865_s29   ;;  %s32_s9 = sadd.s32 1, %s1861_s28 }
   0x9   : > { %s29_s10 = ssub.s32 %s1865_s29, %s1942_s8  ;;  %p39_p0 = scmp.ne.s32.totalorder %s1861_s28, %s1857_s27 }
   0xa   : > { %p30_p1 = scmp.eq.s32.totalorder %s29_s10, 0  ;;  %p40_p2 = scmp.eq.s32.totalorder %s1865_s29, 0 }
   0xb   : > { %p45_p3 = scmp.ne.s32.totalorder %s1857_s27, %s1853_s26  ;;  %p46_p4 = scmp.eq.s32.totalorder %s1938_s0, 0 }
   0xc   : > { %s1954_s11 = scalar_select %p30_p1, %s1861_s28, %s32_s9  }
   0xd   : > { %p1956_p5 = por %p40_p2, %p39_p0  ;;  %p1960_p6 = por %p46_p4, %p45_p3 }
   0xe   : > { %p132_p7 = scmp.eq.s32.totalorder %s1938_s0, 1  ;;  %p138_p8 = scmp.eq.s32.totalorder %s1568_s30, 1 }
   0xf   : > { %p1726_p10 = scmp.lt.s32.totalorder %s1865_s29, 2  ;;  %s209_s16 = sand.u32 1, %s1861_s28  }
  0x10   : > { %p1967_p11 = por %p132_p7, %p39_p0  ;;  %p1971_p12 = por %p138_p8, %p45_p3 }
  0x11   : > { %s1712_s17 = sshll.u32 %s1865_s29, 10  ;;  %s1571_s18 = sshll.u32 %s209_s16, 10 }
  0x12   : > { %s2273_s14 = scalar_select %p1967_p11, 1, 0 }
  0x13   : > { %s2274_s15 = scalar_select %p1971_p12, 1, 0 }
  0x14   : > { %s1980_s21 = scalar_lea.hbm %s2263_s1, %s1712_s17  ;;  %s213_s22 = scalar_lea.vmem [#allocation6], %s1571_s18 }
  0x15   : > { %s220_s23 = sshll.u32 %s213_s22, 4  ;;  %p1984_p13 = pnand %p1726_p10, %p1956_p5  ;;  %s1988_s23 = int_to_ptr.vmem [resolvable:$true] %s220_s23 }
  0x16   : > { %s1991_s25 = scalar_lea.sflag [#allocation7], %s209_s16  ;;  %s1769_s30 = scalar_lea.hbm %s1980_s21, 16384 }
  0x17   : > { %p1770_p1 = scmp.ne.s32.totalorder %s1980_s21, %s1769_s30  ;;  %p1771_p2 = pneg %p1984_p13 }
  0x18   : > { %s1774_s12 = scalar_lea.hbm %s2263_s1, 32768  ;;  %p1775_p5 = scmp.lt.u32.totalorder %s1980_s21, %s2263_s1 }
  0x19   : > { %p1772_p3 = pnand %p1771_p2, %p1770_p1  ;;  %p1776_p7 = scmp.lt.u32.totalorder %s1774_s12, %s1769_s30 }
  0x1a   : > { %p1778_p10 = scmp.lt.u32.totalorder %s1769_s30, %s1980_s21 }
  0x1b   : > { %p1773_p4 = pneg %p1772_p3  ;;  %p1777_p8 = por %p1776_p7, %p1775_p5 }
  0x1d   : > { %p1779_p9 = por %p1778_p10, %p1777_p8 }
  0x1f   : > { %p1780_p0 = pnand %p1779_p9, %p1773_p4 }
  0x21   : > { %1783 = shalt.err (!%p1780_p0)
}
  0x22   : > { %s1784_s16 = scalar_lea.vmem %s1988_s23, 16384  ;;  %s1867_s19 = smov [#allocation6]  }
  0x23   : > { %p1785_p1 = scmp.ne.s32.totalorder %s1988_s23, %s1784_s16  ;;  %s1789_s20 = sshll.u32 %s1867_s19, 4  ;;  %s1790_s20 = int_to_ptr.vmem [resolvable:$false] %s1789_s20 }
  0x24   : > { %s1791_s22 = scalar_lea.vmem %s1790_s20, 32768  ;;  %p1792_p11 = scmp.lt.s32.totalorder %s1988_s23, %s1790_s20 }
  0x25   : > { %p1787_p3 = pnand %p1785_p1, %p1771_p2  ;;  %p1793_p5 = scmp.lt.s32.totalorder %s1791_s22, %s1784_s16 }
  0x27   : > { %p1788_p12 = pneg %p1787_p3  ;;  %p1794_p7 = por %p1793_p5, %p1792_p11 }
  0x29   : > { %p1795_p8 = pnand %p1794_p7, %p1788_p12 }
  0x2b   : > { %1798 = shalt.err (!%p1795_p8)
}
  0x2c   : > { %s1868_s30 = smov 2048   ;;  %s1869_s9 = smov 1024  }
  0x2d   : > { %s1870_s10 = smov 64   ;;  %p228_p9 = scmp.lt.s32.totalorder %s1865_s29, 3 }
  0x2e   : > { %1721 = dma.hbm_to_vmem [thread:$0]  (!%p1984_p13), %s1980_s21, 16384, %s1988_s23, %s1991_s25, %s1868_s30, %s1869_s9, %s1870_s10  }
  0x2f   : > { %p2276_p0 = scmp.ge.s32.totalorder %s1865_s29, 1 }
  0x31   : > { %p229_p2 = pnand %p2276_p0, %p228_p9 }
  0x32   : > { %s2023_s12 = sand.u32 (!%p229_p2), 1, %s1857_s27  }
  0x33   : > { %232 = sbr.rel (%p229_p2) target bundleno = 627 (0x273), region = 36  ;;  %s1575_s17 = sshll.u32 (!%p229_p2), %s2023_s12, 10 }
  0x34   : > { %s235_s18 = scalar_lea.sflag (!%p229_p2), [#allocation7], %s2023_s12  ;;  %s2027_s16 = scalar_lea.vmem (!%p229_p2), [#allocation6], %s1575_s17 }
  0x3a   : > { %1844 = dma.done.wait (%p1960_p6), %s235_s18, 16384  }
  0x3b   : > { %1846 = vsyncadd (%p1960_p6), %s235_s18, 4294950912  ;;  %s1576_s21 = sshll.u32 %s2023_s12, 7  ;;  %p1577_p11 = scmp.ne.s32.totalorder %s1938_s0, 0 }
  0x3c   : > { %s2034_s23 = scalar_lea.vmem [#allocation9], %s1576_s21  ;;  %vm274_vm0 = vcmask (!%p1577_p11), 7168   ;;  %v1871_v0 = vmov (!%p1577_p11), 0.0  }
  0x3d   : > { %273 = sbr.rel (%p1577_p11) target bundleno = 68 (0x44), region = 44  ;;  %275 = vst.msk [vmem:[#allocation2] sm:$0xff] (!%p1577_p11), %vm274_vm0, %v1871_v0  ;;  %276 = vst.msk [vmem:[#allocation3] sm:$0xff] (!%p1577_p11), %vm274_vm0, %v1871_v0 }
  0x44 PF: > { %v278_v1 = vld [vmem:[%s2027_s16] sm:$0xff]  ;;  %v279_v3 = vld [vmem:[%s2027_s16 + $0x8] sm:$0xff]  ;;  %v1872_v9 = vmov 0   ;;  %v280_v0 = vld [vmem:[%s2027_s16 + $0x10] sm:$0xff]  ;;  %vm1409_vm1 = vcmask 7168   ;;  %p1706_p6 = scmp.ne.s32.totalorder %s1938_s0, 1 }
  0x45   : > { %v286_v2 = vld [vmem:[%s2027_s16 + $0x40] sm:$0xff]  ;;  %v287_v6 = vld [vmem:[%s2027_s16 + $0x48] sm:$0xff]  ;;  %1078 = vmatprep.mubr.bf16.mxu0 %v1872_v9  ;;  %1119 = vmatprep.mubr.bf16.mxu1 %v1872_v9  ;;  %s1451_s25 = sld [smem:[#allocation5]] (!%p1706_p6) }
  0x46   : > { %v1579_v4 = vcombine.high %v278_v1, %v286_v2  ;;  %v1578_v5 = vcombine.low %v278_v1, %v286_v2  ;;  %v294_v7 = vld [vmem:[%s2027_s16 + $0x80] sm:$0xff]  ;;  %v1581_v10 = vcombine.high %v279_v3, %v287_v6  ;;  %v1580_v11 = vcombine.low %v279_v3, %v287_v6  ;;  %v295_v13 = vld [vmem:[%s2027_s16 + $0x88] sm:$0xff]  ;;  %v288_v1 = vld [vmem:[%s2027_s16 + $0x50] sm:$0xff] }
  0x47   : > { %v302_v8 = vld [vmem:[%s2027_s16 + $0xc0] sm:$0xff]  ;;  %v303_v14 = vld [vmem:[%s2027_s16 + $0xc8] sm:$0xff]  ;;  %v281_v2 = vld [vmem:[%s2027_s16 + $0x18] sm:$0xff]  ;;  %v1583_v6 = vcombine.high %v280_v0, %v288_v1 }
  0x48   : > { %v1595_v12 = vcombine.high %v294_v7, %v302_v8  ;;  %v310_v15 = vld [vmem:[%s2027_s16 + $0x100] sm:$0xff]  ;;  %1046 = vmatprep.subr.bf16.mxu0 %v1579_v4  ;;  %v1597_v16 = vcombine.high %v295_v13, %v303_v14  ;;  %v311_v18 = vld [vmem:[%s2027_s16 + $0x108] sm:$0xff]  ;;  %1087 = vmatprep.subr.bf16.mxu1 %v1581_v10  ;;  %v1594_v20 = vcombine.low %v294_v7, %v302_v8  ;;  %v289_v3 = vld [vmem:[%s2027_s16 + $0x58] sm:$0xff] }
  0x49   : > { %v318_v17 = vld [vmem:[%s2027_s16 + $0x140] sm:$0xff]  ;;  %v319_v19 = vld [vmem:[%s2027_s16 + $0x148] sm:$0xff]  ;;  %1047 = vmatpush1.bf16.msra.mxu0 %v1578_v5  ;;  %1088 = vmatpush1.bf16.msra.mxu1 %v1580_v11  ;;  %v1596_v21 = vcombine.low %v295_v13, %v303_v14  ;;  %v1585_v7 = vcombine.high %v281_v2, %v289_v3  ;;  %v296_v8 = vld [vmem:[%s2027_s16 + $0x90] sm:$0xff]  ;;  %v1582_v14 = vcombine.low %v280_v0, %v288_v1 }
  0x4a   : > { %1048 = vmatprep.subr.bf16.mxu0 %v1595_v12  ;;  %v1611_v22 = vcombine.high %v310_v15, %v318_v17  ;;  %1089 = vmatprep.subr.bf16.mxu1 %v1597_v16  ;;  %v1613_v23 = vcombine.high %v311_v18, %v319_v19  ;;  %v326_v24 = vld [vmem:[%s2027_s16 + $0x180] sm:$0xff]  ;;  %v327_v26 = vld [vmem:[%s2027_s16 + $0x188] sm:$0xff]  ;;  %v1610_v28 = vcombine.low %v310_v15, %v318_v17  ;;  %v304_v10 = vld [vmem:[%s2027_s16 + $0xd0] sm:$0xff] }
  0x4b   : > { %v334_v25 = vld [vmem:[%s2027_s16 + $0x1c0] sm:$0xff]  ;;  %v335_v27 = vld [vmem:[%s2027_s16 + $0x1c8] sm:$0xff]  ;;  %v1612_v29 = vcombine.low %v311_v18, %v319_v19  ;;  %v297_v11 = vld [vmem:[%s2027_s16 + $0x98] sm:$0xff]  ;;  %v1584_v15 = vcombine.low %v281_v2, %v289_v3  ;;  %v1599_v16 = vcombine.high %v296_v8, %v304_v10  ;;  %s1452_s19 = scvt.s32.f32 (!%p1706_p6), %s1451_s25 }
  0x4c   : > { %v1627_v30 = vcombine.high %v326_v24, %v334_v25  ;;  %v1629_v31 = vcombine.high %v327_v26, %v335_v27  ;;  %v342_v32 = vld [vmem:[%s2027_s16 + $0x200] sm:$0xff]  ;;  %v343_v34 = vld [vmem:[%s2027_s16 + $0x208] sm:$0xff]  ;;  %v1626_v36 = vcombine.low %v326_v24, %v334_v25  ;;  %v1628_v37 = vcombine.low %v327_v26, %v335_v27  ;;  %v305_v12 = vld [vmem:[%s2027_s16 + $0xd8] sm:$0xff] }
  0x4d   : > { %1049 = vmatpush1.bf16.msra.mxu0 %v1594_v20  ;;  %1090 = vmatpush1.bf16.msra.mxu1 %v1596_v21  ;;  %v350_v33 = vld [vmem:[%s2027_s16 + $0x240] sm:$0xff]  ;;  %v351_v35 = vld [vmem:[%s2027_s16 + $0x248] sm:$0xff]  ;;  %v2082_v13 = vld [vmem:[%s2264_s2] sm:$0xf]  ;;  %v1601_v17 = vcombine.high %v297_v11, %v305_v12 }
  0x4e   : > { %1050 = vmatprep.subr.bf16.mxu0 %v1611_v22  ;;  %1091 = vmatprep.subr.bf16.mxu1 %v1613_v23  ;;  %v1643_v38 = vcombine.high %v342_v32, %v350_v33  ;;  %v1645_v39 = vcombine.high %v343_v34, %v351_v35  ;;  %v358_v40 = vld [vmem:[%s2027_s16 + $0x280] sm:$0xff]  ;;  %v359_v42 = vld [vmem:[%s2027_s16 + $0x288] sm:$0xff]  ;;  %v1642_v44 = vcombine.low %v342_v32, %v350_v33  ;;  %v312_v18 = vld [vmem:[%s2027_s16 + $0x110] sm:$0xff] }
  0x4f   : > { %v366_v41 = vld [vmem:[%s2027_s16 + $0x2c0] sm:$0xff]  ;;  %v367_v43 = vld [vmem:[%s2027_s16 + $0x2c8] sm:$0xff]  ;;  %v1644_v45 = vcombine.low %v343_v34, %v351_v35  ;;  %v320_v19 = vld [vmem:[%s2027_s16 + $0x150] sm:$0xff]  ;;  %v1598_v22 = vcombine.low %v296_v8, %v304_v10  ;;  %v1600_v23 = vcombine.low %v297_v11, %v305_v12 }
  0x50   : > { %v1659_v46 = vcombine.high %v358_v40, %v366_v41  ;;  %v1661_v47 = vcombine.high %v359_v42, %v367_v43  ;;  %v374_v48 = vld [vmem:[%s2027_s16 + $0x300] sm:$0xff]  ;;  %v375_v50 = vld [vmem:[%s2027_s16 + $0x308] sm:$0xff]  ;;  %v1658_v52 = vcombine.low %v358_v40, %v366_v41  ;;  %v1660_v53 = vcombine.low %v359_v42, %v367_v43  ;;  %v313_v20 = vld [vmem:[%s2027_s16 + $0x118] sm:$0xff] }
  0x51   : > { %1051 = vmatpush1.bf16.msra.mxu0 %v1610_v28  ;;  %1092 = vmatpush1.bf16.msra.mxu1 %v1612_v29  ;;  %v382_v49 = vld [vmem:[%s2027_s16 + $0x340] sm:$0xff]  ;;  %v383_v51 = vld [vmem:[%s2027_s16 + $0x348] sm:$0xff]  ;;  %v321_v21 = vld [vmem:[%s2027_s16 + $0x158] sm:$0xff]  ;;  %v1615_v24 = vcombine.high %v312_v18, %v320_v19 }
  0x52   : > { %1052 = vmatprep.subr.bf16.mxu0 %v1627_v30  ;;  %1093 = vmatprep.subr.bf16.mxu1 %v1629_v31  ;;  %v1675_v54 = vcombine.high %v374_v48, %v382_v49  ;;  %v1677_v55 = vcombine.high %v375_v50, %v383_v51  ;;  %v390_v56 = vld [vmem:[%s2027_s16 + $0x380] sm:$0xff]  ;;  %v391_v58 = vld [vmem:[%s2027_s16 + $0x388] sm:$0xff]  ;;  %v1674_v60 = vcombine.low %v374_v48, %v382_v49  ;;  %v328_v26 = vld [vmem:[%s2027_s16 + $0x190] sm:$0xff] }
  0x53   : > { %v398_v57 = vld [vmem:[%s2027_s16 + $0x3c0] sm:$0xff]  ;;  %v399_v59 = vld [vmem:[%s2027_s16 + $0x3c8] sm:$0xff]  ;;  %v1676_v61 = vcombine.low %v375_v50, %v383_v51  ;;  %v1617_v25 = vcombine.high %v313_v20, %v321_v21  ;;  %v336_v27 = vld [vmem:[%s2027_s16 + $0x1d0] sm:$0xff]  ;;  %v1614_v30 = vcombine.low %v312_v18, %v320_v19  ;;  %v1616_v31 = vcombine.low %v313_v20, %v321_v21 }
  0x54   : > { %v1691_v62 = vcombine.high %v390_v56, %v398_v57  ;;  %v1693_v63 = vcombine.high %v391_v58, %v399_v59  ;;  %v1690_v4 = vcombine.low %v390_v56, %v398_v57  ;;  %v1692_v5 = vcombine.low %v391_v58, %v399_v59  ;;  %v329_v28 = vld [vmem:[%s2027_s16 + $0x198] sm:$0xff]  ;;  %v344_v34 = vld [vmem:[%s2027_s16 + $0x210] sm:$0xff]  ;;  %v282_v2 = vld [vmem:[%s2027_s16 + $0x20] sm:$0xff] }
  0x55   : > { %1053 = vmatpush1.bf16.msra.mxu0 %v1626_v36  ;;  %1094 = vmatpush1.bf16.msra.mxu1 %v1628_v37  ;;  %v337_v29 = vld [vmem:[%s2027_s16 + $0x1d8] sm:$0xff]  ;;  %v1631_v32 = vcombine.high %v328_v26, %v336_v27  ;;  %v352_v35 = vld [vmem:[%s2027_s16 + $0x250] sm:$0xff]  ;;  %v290_v3 = vld [vmem:[%s2027_s16 + $0x60] sm:$0xff] }
  0x56   : > { %1054 = vmatprep.subr.bf16.mxu0 %v1643_v38  ;;  %1095 = vmatprep.subr.bf16.mxu1 %v1645_v39  ;;  %v1633_v33 = vcombine.high %v329_v28, %v337_v29  ;;  %v345_v36 = vld [vmem:[%s2027_s16 + $0x218] sm:$0xff]  ;;  %v1630_v38 = vcombine.low %v328_v26, %v336_v27  ;;  %v1632_v39 = vcombine.low %v329_v28, %v337_v29  ;;  %v360_v42 = vld [vmem:[%s2027_s16 + $0x290] sm:$0xff]  ;;  %v298_v11 = vld [vmem:[%s2027_s16 + $0xa0] sm:$0xff] }
  0x57   : > { %v353_v37 = vld [vmem:[%s2027_s16 + $0x258] sm:$0xff]  ;;  %v1647_v40 = vcombine.high %v344_v34, %v352_v35  ;;  %v368_v43 = vld [vmem:[%s2027_s16 + $0x2d0] sm:$0xff]  ;;  %v1587_v8 = vcombine.high %v282_v2, %v290_v3  ;;  %v306_v12 = vld [vmem:[%s2027_s16 + $0xe0] sm:$0xff] }
  0x58   : > { %v1649_v41 = vcombine.high %v345_v36, %v353_v37  ;;  %v1663_v48 = vcombine.high %v360_v42, %v368_v43  ;;  %v376_v50 = vld [vmem:[%s2027_s16 + $0x310] sm:$0xff]  ;;  %v1603_v18 = vcombine.high %v298_v11, %v306_v12  ;;  %v314_v20 = vld [vmem:[%s2027_s16 + $0x120] sm:$0xff] }
  0x59   : > { %1055 = vmatpush1.bf16.msra.mxu0 %v1642_v44  ;;  %1096 = vmatpush1.bf16.msra.mxu1 %v1644_v45  ;;  %v361_v44 = vld [vmem:[%s2027_s16 + $0x298] sm:$0xff]  ;;  %v384_v51 = vld [vmem:[%s2027_s16 + $0x350] sm:$0xff]  ;;  %v322_v21 = vld [vmem:[%s2027_s16 + $0x160] sm:$0xff] }
  0x5a   : > { %1056 = vmatprep.subr.bf16.mxu0 %v1659_v46  ;;  %1097 = vmatprep.subr.bf16.mxu1 %v1661_v47  ;;  %v369_v45 = vld [vmem:[%s2027_s16 + $0x2d8] sm:$0xff]  ;;  %v1646_v46 = vcombine.low %v344_v34, %v352_v35  ;;  %v1648_v47 = vcombine.low %v345_v36, %v353_v37  ;;  %v1679_v56 = vcombine.high %v376_v50, %v384_v51  ;;  %v392_v58 = vld [vmem:[%s2027_s16 + $0x390] sm:$0xff]  ;;  %v330_v28 = vld [vmem:[%s2027_s16 + $0x1a0] sm:$0xff] }
  0x5b   : > { %v1665_v49 = vcombine.high %v361_v44, %v369_v45  ;;  %v400_v59 = vld [vmem:[%s2027_s16 + $0x3d0] sm:$0xff]  ;;  %v1619_v26 = vcombine.high %v314_v20, %v322_v21  ;;  %v338_v29 = vld [vmem:[%s2027_s16 + $0x1e0] sm:$0xff] }
  0x5c   : > { %v1695_v0 = vcombine.high %v392_v58, %v400_v59  ;;  %v1635_v34 = vcombine.high %v330_v28, %v338_v29  ;;  %v346_v36 = vld [vmem:[%s2027_s16 + $0x220] sm:$0xff] }
  0x5d   : > { %1057 = vmatpush1.bf16.msra.mxu0 %v1658_v52  ;;  %1098 = vmatpush1.bf16.msra.mxu1 %v1660_v53  ;;  %v377_v52 = vld [vmem:[%s2027_s16 + $0x318] sm:$0xff]  ;;  %v354_v37 = vld [vmem:[%s2027_s16 + $0x260] sm:$0xff] }
  0x5e   : > { %1058 = vmatprep.subr.bf16.mxu0 %v1675_v54  ;;  %1099 = vmatprep.subr.bf16.mxu1 %v1677_v55  ;;  %v385_v53 = vld [vmem:[%s2027_s16 + $0x358] sm:$0xff]  ;;  %v1662_v54 = vcombine.low %v360_v42, %v368_v43  ;;  %v1664_v55 = vcombine.low %v361_v44, %v369_v45  ;;  %v1651_v42 = vcombine.high %v346_v36, %v354_v37  ;;  %v362_v44 = vld [vmem:[%s2027_s16 + $0x2a0] sm:$0xff] }
  0x5f   : > { %v1681_v57 = vcombine.high %v377_v52, %v385_v53  ;;  %v370_v45 = vld [vmem:[%s2027_s16 + $0x2e0] sm:$0xff] }
  0x61   : > { %1059 = vmatpush1.bf16.msra.mxu0 %v1674_v60  ;;  %1100 = vmatpush1.bf16.msra.mxu1 %v1676_v61  ;;  %v393_v60 = vld [vmem:[%s2027_s16 + $0x398] sm:$0xff] }
  0x62   : > { %1060 = vmatprep.subr.bf16.mxu0 %v1691_v62  ;;  %1101 = vmatprep.subr.bf16.mxu1 %v1693_v63  ;;  %v401_v61 = vld [vmem:[%s2027_s16 + $0x3d8] sm:$0xff]  ;;  %v1678_v62 = vcombine.low %v376_v50, %v384_v51  ;;  %v1680_v63 = vcombine.low %v377_v52, %v385_v53  ;;  %v1667_v50 = vcombine.high %v362_v44, %v370_v45  ;;  %v378_v52 = vld [vmem:[%s2027_s16 + $0x320] sm:$0xff] }
  0x63   : > { %v1697_v1 = vcombine.high %v393_v60, %v401_v61  ;;  %v386_v53 = vld [vmem:[%s2027_s16 + $0x360] sm:$0xff] }
  0x65   : > { %1061 = vmatpush1.bf16.msra.mxu0 %v1690_v4  ;;  %1102 = vmatpush1.bf16.msra.mxu1 %v1692_v5  ;;  %v283_v4 = vld [vmem:[%s2027_s16 + $0x28] sm:$0xff] }
  0x66   : > { %1128 = vmatprep.subr.bf16.mxu0 %v1583_v6  ;;  %1169 = vmatprep.subr.bf16.mxu1 %v1585_v7  ;;  %v291_v5 = vld [vmem:[%s2027_s16 + $0x68] sm:$0xff]  ;;  %v1694_v6 = vcombine.low %v392_v58, %v400_v59  ;;  %v1696_v7 = vcombine.low %v393_v60, %v401_v61  ;;  %v1683_v58 = vcombine.high %v378_v52, %v386_v53  ;;  %v394_v60 = vld [vmem:[%s2027_s16 + $0x3a0] sm:$0xff] }
  0x67   : > { %v1589_v10 = vcombine.high %v283_v4, %v291_v5  ;;  %v402_v61 = vld [vmem:[%s2027_s16 + $0x3e0] sm:$0xff] }
  0x68   : > { %1079 = vmatmul.mubr.bf16.vlgmr.msra.gmra.mrb[0].mxu0 %v2082_v13  ;;  %1120 = vmatmul.mubr.bf16.vlgmr.msra.gmra.mrb[0].mxu1 %v2082_v13 }
  0x69   : > { %1129 = vmatpush1.bf16.msra.mxu0 %v1582_v14  ;;  %1170 = vmatpush1.bf16.msra.mxu1 %v1584_v15  ;;  %v299_v14 = vld [vmem:[%s2027_s16 + $0xa8] sm:$0xff] }
  0x6a   : > { %1130 = vmatprep.subr.bf16.mxu0 %v1599_v16  ;;  %1171 = vmatprep.subr.bf16.mxu1 %v1601_v17  ;;  %v307_v15 = vld [vmem:[%s2027_s16 + $0xe8] sm:$0xff]  ;;  %v1586_v16 = vcombine.low %v282_v2, %v290_v3  ;;  %v1588_v17 = vcombine.low %v283_v4, %v291_v5  ;;  %v1699_v2 = vcombine.high %v394_v60, %v402_v61  ;;  %v284_v4 = vld [vmem:[%s2027_s16 + $0x30] sm:$0xff] }
  0x6b   : > { %1160 = vmatprep.mubr.bf16.mxu0 %v1872_v9  ;;  %1201 = vmatprep.mubr.bf16.mxu1 %v1872_v9  ;;  %v1605_v19 = vcombine.high %v299_v14, %v307_v15  ;;  %v292_v5 = vld [vmem:[%s2027_s16 + $0x70] sm:$0xff] }
  0x6d   : > { %1131 = vmatpush1.bf16.msra.mxu0 %v1598_v22  ;;  %1172 = vmatpush1.bf16.msra.mxu1 %v1600_v23  ;;  %v315_v22 = vld [vmem:[%s2027_s16 + $0x128] sm:$0xff] }
  0x6e   : > { %1132 = vmatprep.subr.bf16.mxu0 %v1615_v24  ;;  %1173 = vmatprep.subr.bf16.mxu1 %v1617_v25  ;;  %v323_v23 = vld [vmem:[%s2027_s16 + $0x168] sm:$0xff]  ;;  %v1602_v24 = vcombine.low %v298_v11, %v306_v12  ;;  %v1604_v25 = vcombine.low %v299_v14, %v307_v15  ;;  %v1591_v11 = vcombine.high %v284_v4, %v292_v5  ;;  %v300_v14 = vld [vmem:[%s2027_s16 + $0xb0] sm:$0xff] }
  0x6f   : > { %v1621_v27 = vcombine.high %v315_v22, %v323_v23  ;;  %v308_v15 = vld [vmem:[%s2027_s16 + $0xf0] sm:$0xff] }
  0x71   : > { %1133 = vmatpush1.bf16.msra.mxu0 %v1614_v30  ;;  %1174 = vmatpush1.bf16.msra.mxu1 %v1616_v31  ;;  %v331_v30 = vld [vmem:[%s2027_s16 + $0x1a8] sm:$0xff] }
  0x72   : > { %1134 = vmatprep.subr.bf16.mxu0 %v1631_v32  ;;  %1175 = vmatprep.subr.bf16.mxu1 %v1633_v33  ;;  %v339_v31 = vld [vmem:[%s2027_s16 + $0x1e8] sm:$0xff]  ;;  %v1618_v32 = vcombine.low %v314_v20, %v322_v21  ;;  %v1620_v33 = vcombine.low %v315_v22, %v323_v23  ;;  %v1607_v20 = vcombine.high %v300_v14, %v308_v15  ;;  %v316_v22 = vld [vmem:[%s2027_s16 + $0x130] sm:$0xff] }
  0x73   : > { %v1637_v35 = vcombine.high %v331_v30, %v339_v31  ;;  %v324_v23 = vld [vmem:[%s2027_s16 + $0x170] sm:$0xff] }
  0x75   : > { %1135 = vmatpush1.bf16.msra.mxu0 %v1630_v38  ;;  %1176 = vmatpush1.bf16.msra.mxu1 %v1632_v39  ;;  %v347_v38 = vld [vmem:[%s2027_s16 + $0x228] sm:$0xff] }
  0x76   : > { %1136 = vmatprep.subr.bf16.mxu0 %v1647_v40  ;;  %1177 = vmatprep.subr.bf16.mxu1 %v1649_v41  ;;  %v355_v39 = vld [vmem:[%s2027_s16 + $0x268] sm:$0xff]  ;;  %v1634_v40 = vcombine.low %v330_v28, %v338_v29  ;;  %v1636_v41 = vcombine.low %v331_v30, %v339_v31  ;;  %v1623_v28 = vcombine.high %v316_v22, %v324_v23  ;;  %v332_v30 = vld [vmem:[%s2027_s16 + $0x1b0] sm:$0xff] }
  0x77   : > { %v1653_v43 = vcombine.high %v347_v38, %v355_v39  ;;  %v340_v31 = vld [vmem:[%s2027_s16 + $0x1f0] sm:$0xff] }
  0x79   : > { %1137 = vmatpush1.bf16.msra.mxu0 %v1646_v46  ;;  %1178 = vmatpush1.bf16.msra.mxu1 %v1648_v47  ;;  %v363_v46 = vld [vmem:[%s2027_s16 + $0x2a8] sm:$0xff] }
  0x7a   : > { %1138 = vmatprep.subr.bf16.mxu0 %v1663_v48  ;;  %1179 = vmatprep.subr.bf16.mxu1 %v1665_v49  ;;  %v371_v47 = vld [vmem:[%s2027_s16 + $0x2e8] sm:$0xff]  ;;  %v1650_v48 = vcombine.low %v346_v36, %v354_v37  ;;  %v1652_v49 = vcombine.low %v347_v38, %v355_v39  ;;  %v1639_v36 = vcombine.high %v332_v30, %v340_v31  ;;  %v348_v38 = vld [vmem:[%s2027_s16 + $0x230] sm:$0xff] }
  0x7b   : > { %v1669_v51 = vcombine.high %v363_v46, %v371_v47  ;;  %v356_v39 = vld [vmem:[%s2027_s16 + $0x270] sm:$0xff] }
  0x7d   : > { %1139 = vmatpush1.bf16.msra.mxu0 %v1662_v54  ;;  %1180 = vmatpush1.bf16.msra.mxu1 %v1664_v55  ;;  %v379_v54 = vld [vmem:[%s2027_s16 + $0x328] sm:$0xff] }
  0x7e   : > { %1140 = vmatprep.subr.bf16.mxu0 %v1679_v56  ;;  %1181 = vmatprep.subr.bf16.mxu1 %v1681_v57  ;;  %v387_v55 = vld [vmem:[%s2027_s16 + $0x368] sm:$0xff]  ;;  %v1666_v56 = vcombine.low %v362_v44, %v370_v45  ;;  %v1668_v57 = vcombine.low %v363_v46, %v371_v47  ;;  %v364_v45 = vld [vmem:[%s2027_s16 + $0x2b0] sm:$0xff]  ;;  %v365_v47 = vld [vmem:[%s2027_s16 + $0x2b8] sm:$0xff] }
  0x7f   : > { %v1685_v59 = vcombine.high %v379_v54, %v387_v55  ;;  %v372_v46 = vld [vmem:[%s2027_s16 + $0x2f0] sm:$0xff] }
  0x81   : > { %1141 = vmatpush1.bf16.msra.mxu0 %v1678_v62  ;;  %1182 = vmatpush1.bf16.msra.mxu1 %v1680_v63  ;;  %v395_v62 = vld [vmem:[%s2027_s16 + $0x3a8] sm:$0xff] }
  0x82   : > { %1142 = vmatprep.subr.bf16.mxu0 %v1695_v0  ;;  %1183 = vmatprep.subr.bf16.mxu1 %v1697_v1  ;;  %v403_v63 = vld [vmem:[%s2027_s16 + $0x3e8] sm:$0xff]  ;;  %v1682_v0 = vcombine.low %v378_v52, %v386_v53  ;;  %v1684_v1 = vcombine.low %v379_v54, %v387_v55  ;;  %v380_v53 = vld [vmem:[%s2027_s16 + $0x330] sm:$0xff]  ;;  %v381_v55 = vld [vmem:[%s2027_s16 + $0x338] sm:$0xff] }
  0x83   : > { %v1701_v3 = vcombine.high %v395_v62, %v403_v63  ;;  %v388_v54 = vld [vmem:[%s2027_s16 + $0x370] sm:$0xff] }
  0x85   : > { %1143 = vmatpush1.bf16.msra.mxu0 %v1694_v6  ;;  %1184 = vmatpush1.bf16.msra.mxu1 %v1696_v7  ;;  %v285_v6 = vld [vmem:[%s2027_s16 + $0x38] sm:$0xff] }
  0x86   : > { %1210 = vmatprep.subr.bf16.mxu0 %v1587_v8  ;;  %1251 = vmatprep.subr.bf16.mxu1 %v1589_v10  ;;  %v293_v7 = vld [vmem:[%s2027_s16 + $0x78] sm:$0xff]  ;;  %v1698_v8 = vcombine.low %v394_v60, %v402_v61  ;;  %v1700_v10 = vcombine.low %v395_v62, %v403_v63  ;;  %v396_v61 = vld [vmem:[%s2027_s16 + $0x3b0] sm:$0xff] }
  0x87   : > { %v1593_v12 = vcombine.high %v285_v6, %v293_v7  ;;  %v404_v62 = vld [vmem:[%s2027_s16 + $0x3f0] sm:$0xff]  ;;  %v397_v63 = vld [vmem:[%s2027_s16 + $0x3b8] sm:$0xff] }
  0x88   : > { %1161 = vmatmul.mubr.bf16.vlgmr.msra.gmra.mrb[4].mxu0 %v2082_v13  ;;  %1202 = vmatmul.mubr.bf16.vlgmr.msra.gmra.mrb[4].mxu1 %v2082_v13 }
  0x89   : > { %1211 = vmatpush1.bf16.msra.mxu0 %v1586_v16  ;;  %1252 = vmatpush1.bf16.msra.mxu1 %v1588_v17  ;;  %v301_v16 = vld [vmem:[%s2027_s16 + $0xb8] sm:$0xff] }
  0x8a   : > { %1212 = vmatprep.subr.bf16.mxu0 %v1603_v18  ;;  %1253 = vmatprep.subr.bf16.mxu1 %v1605_v19  ;;  %v309_v17 = vld [vmem:[%s2027_s16 + $0xf8] sm:$0xff]  ;;  %v1590_v18 = vcombine.low %v284_v4, %v292_v5  ;;  %v1592_v19 = vcombine.low %v285_v6, %v293_v7  ;;  %v1702_v5 = vcombine.low %v396_v61, %v404_v62 }
  0x8b   : > { %1242 = vmatprep.mubr.bf16.mxu0 %v1872_v9  ;;  %1283 = vmatprep.mubr.bf16.mxu1 %v1872_v9  ;;  %v1609_v21 = vcombine.high %v301_v16, %v309_v17 }
  0x8d   : > { %1213 = vmatpush1.bf16.msra.mxu0 %v1602_v24  ;;  %1254 = vmatpush1.bf16.msra.mxu1 %v1604_v25  ;;  %v317_v24 = vld [vmem:[%s2027_s16 + $0x138] sm:$0xff] }
  0x8e   : > { %1214 = vmatprep.subr.bf16.mxu0 %v1619_v26  ;;  %1255 = vmatprep.subr.bf16.mxu1 %v1621_v27  ;;  %v325_v25 = vld [vmem:[%s2027_s16 + $0x178] sm:$0xff]  ;;  %v1606_v26 = vcombine.low %v300_v14, %v308_v15  ;;  %v1608_v27 = vcombine.low %v301_v16, %v309_v17 }
  0x8f   : > { %v1625_v29 = vcombine.high %v317_v24, %v325_v25 }
  0x91   : > { %1215 = vmatpush1.bf16.msra.mxu0 %v1618_v32  ;;  %1256 = vmatpush1.bf16.msra.mxu1 %v1620_v33  ;;  %v333_v32 = vld [vmem:[%s2027_s16 + $0x1b8] sm:$0xff] }
  0x92   : > { %1216 = vmatprep.subr.bf16.mxu0 %v1635_v34  ;;  %1257 = vmatprep.subr.bf16.mxu1 %v1637_v35  ;;  %v341_v33 = vld [vmem:[%s2027_s16 + $0x1f8] sm:$0xff]  ;;  %v1622_v34 = vcombine.low %v316_v22, %v324_v23  ;;  %v1624_v35 = vcombine.low %v317_v24, %v325_v25 }
  0x93   : > { %v1641_v37 = vcombine.high %v333_v32, %v341_v33 }
  0x95   : > { %1217 = vmatpush1.bf16.msra.mxu0 %v1634_v40  ;;  %1258 = vmatpush1.bf16.msra.mxu1 %v1636_v41  ;;  %v349_v40 = vld [vmem:[%s2027_s16 + $0x238] sm:$0xff] }
  0x96   : > { %1218 = vmatprep.subr.bf16.mxu0 %v1651_v42  ;;  %1259 = vmatprep.subr.bf16.mxu1 %v1653_v43  ;;  %v357_v41 = vld [vmem:[%s2027_s16 + $0x278] sm:$0xff]  ;;  %v1638_v42 = vcombine.low %v332_v30, %v340_v31  ;;  %v1655_v43 = vcombine.high %v348_v38, %v356_v39 }
  0x97   : > { %v1657_v44 = vcombine.high %v349_v40, %v357_v41 }
  0x99   : > { %1219 = vmatpush1.bf16.msra.mxu0 %v1650_v48  ;;  %1260 = vmatpush1.bf16.msra.mxu1 %v1652_v49  ;;  %v373_v48 = vld [vmem:[%s2027_s16 + $0x2f8] sm:$0xff]  ;;  %v1654_v49 = vcombine.low %v348_v38, %v356_v39 }
  0x9a   : > { %1220 = vmatprep.subr.bf16.mxu0 %v1667_v50  ;;  %1261 = vmatprep.subr.bf16.mxu1 %v1669_v51  ;;  %v1656_v50 = vcombine.low %v349_v40, %v357_v41  ;;  %v1671_v51 = vcombine.high %v364_v45, %v372_v46  ;;  %v1673_v52 = vcombine.high %v365_v47, %v373_v48 }
  0x9d   : > { %1221 = vmatpush1.bf16.msra.mxu0 %v1666_v56  ;;  %1262 = vmatpush1.bf16.msra.mxu1 %v1668_v57  ;;  %v389_v56 = vld [vmem:[%s2027_s16 + $0x378] sm:$0xff]  ;;  %v1670_v57 = vcombine.low %v364_v45, %v372_v46 }
  0x9e   : > { %1222 = vmatprep.subr.bf16.mxu0 %v1683_v58  ;;  %1263 = vmatprep.subr.bf16.mxu1 %v1685_v59  ;;  %v1672_v58 = vcombine.low %v365_v47, %v373_v48  ;;  %v1687_v59 = vcombine.high %v380_v53, %v388_v54  ;;  %v1689_v60 = vcombine.high %v381_v55, %v389_v56 }
  0xa1   : > { %1223 = vmatpush1.bf16.msra.mxu0 %v1682_v0  ;;  %1264 = vmatpush1.bf16.msra.mxu1 %v1684_v1  ;;  %v405_v0 = vld [vmem:[%s2027_s16 + $0x3f8] sm:$0xff]  ;;  %v1686_v1 = vcombine.low %v380_v53, %v388_v54 }
  0xa2   : > { %1224 = vmatprep.subr.bf16.mxu0 %v1699_v2  ;;  %1265 = vmatprep.subr.bf16.mxu1 %v1701_v3  ;;  %v1688_v2 = vcombine.low %v381_v55, %v389_v56  ;;  %v1703_v3 = vcombine.high %v396_v61, %v404_v62  ;;  %v1705_v4 = vcombine.high %v397_v63, %v405_v0 }
  0xa3   : > { %v1704_v6 = vcombine.low %v397_v63, %v405_v0 }
  0xa5   : > { %1225 = vmatpush1.bf16.msra.mxu0 %v1698_v8  ;;  %1266 = vmatpush1.bf16.msra.mxu1 %v1700_v10 }
  0xa6   : > { %1292 = vmatprep.subr.bf16.mxu0 %v1591_v11  ;;  %1333 = vmatprep.subr.bf16.mxu1 %v1593_v12 }
  0xa8   : > { %1243 = vmatmul.mubr.bf16.vlgmr.msra.gmra.mrb[8].mxu0 %v2082_v13  ;;  %1284 = vmatmul.mubr.bf16.vlgmr.msra.gmra.mrb[8].mxu1 %v2082_v13 }
  0xa9   : > { %1293 = vmatpush1.bf16.msra.mxu0 %v1590_v18  ;;  %1334 = vmatpush1.bf16.msra.mxu1 %v1592_v19 }
  0xaa   : > { %1294 = vmatprep.subr.bf16.mxu0 %v1607_v20  ;;  %1335 = vmatprep.subr.bf16.mxu1 %v1609_v21 }
  0xab   : > { %1324 = vmatprep.mubr.bf16.mxu0 %v1872_v9  ;;  %1365 = vmatprep.mubr.bf16.mxu1 %v1872_v9  ;;  %v1640_v9 = vcombine.low %v333_v32, %v341_v33 }
  0xad   : > { %1295 = vmatpush1.bf16.msra.mxu0 %v1606_v26  ;;  %1336 = vmatpush1.bf16.msra.mxu1 %v1608_v27 }
  0xae   : > { %1296 = vmatprep.subr.bf16.mxu0 %v1623_v28  ;;  %1337 = vmatprep.subr.bf16.mxu1 %v1625_v29 }
  0xb1   : > { %1297 = vmatpush1.bf16.msra.mxu0 %v1622_v34  ;;  %1338 = vmatpush1.bf16.msra.mxu1 %v1624_v35 }
  0xb2   : > { %1298 = vmatprep.subr.bf16.mxu0 %v1639_v36  ;;  %1339 = vmatprep.subr.bf16.mxu1 %v1641_v37 }
  0xb5   : > { %1299 = vmatpush1.bf16.msra.mxu0 %v1638_v42  ;;  %1340 = vmatpush1.bf16.msra.mxu1 %v1640_v9 }
  0xb6   : > { %1300 = vmatprep.subr.bf16.mxu0 %v1655_v43  ;;  %1341 = vmatprep.subr.bf16.mxu1 %v1657_v44 }
  0xb9   : > { %1301 = vmatpush1.bf16.msra.mxu0 %v1654_v49  ;;  %1342 = vmatpush1.bf16.msra.mxu1 %v1656_v50 }
  0xba   : > { %1302 = vmatprep.subr.bf16.mxu0 %v1671_v51  ;;  %1343 = vmatprep.subr.bf16.mxu1 %v1673_v52 }
  0xbd   : > { %1303 = vmatpush1.bf16.msra.mxu0 %v1670_v57  ;;  %1344 = vmatpush1.bf16.msra.mxu1 %v1672_v58 }
  0xbe   : > { %1304 = vmatprep.subr.bf16.mxu0 %v1687_v59  ;;  %1345 = vmatprep.subr.bf16.mxu1 %v1689_v60 }
  0xc1   : > { %1305 = vmatpush1.bf16.msra.mxu0 %v1686_v1  ;;  %1346 = vmatpush1.bf16.msra.mxu1 %v1688_v2 }
  0xc2   : > { %1306 = vmatprep.subr.bf16.mxu0 %v1703_v3  ;;  %1347 = vmatprep.subr.bf16.mxu1 %v1705_v4 }
  0xc5   : > { %1307 = vmatpush1.bf16.msra.mxu0 %v1702_v5  ;;  %1348 = vmatpush1.bf16.msra.mxu1 %v1704_v6 }
  0xc8   : > { %1325 = vmatmul.mubr.bf16.vlgmr.msra.gmra.mrb[12].mxu0 %v2082_v13  ;;  %1366 = vmatmul.mubr.bf16.vlgmr.msra.gmra.mrb[12].mxu1 %v2082_v13 }
 0x13b   : > { %v1080_v7 = vpop.f32.mrb[0].mxu0  ;;  %v1121_v11 = vpop.f32.mrb[0].mxu1 }
 0x13c   : > { %1374 = vst [vmem:[%s2034_s23] sm:$0xff] %v1080_v7  ;;  %v1412_v8 = vmul.f32 %v1080_v7, %v1080_v7  ;;  %v1082_v10 = vpop.f32.mrb[1].mxu0  ;;  %1376 = vst [vmem:[%s2034_s23 + $0x10] sm:$0xff] %v1121_v11  ;;  %v1414_v16 = vmul.f32 %v1121_v11, %v1121_v11  ;;  %v1123_v17 = vpop.f32.mrb[1].mxu1 }
 0x13d   : > { %1375 = vst [vmem:[%s2034_s23 + $0x8] sm:$0xff] %v1082_v10  ;;  %v1391_v12 = vadd.f32 %v1082_v10, %v1080_v7  ;;  %v1413_v14 = vmul.f32 %v1082_v10, %v1082_v10  ;;  %v1084_v15 = vpop.f32.mrb[2].mxu0  ;;  %1377 = vst [vmem:[%s2034_s23 + $0x18] sm:$0xff] %v1123_v17  ;;  %v1125_v19 = vpop.f32.mrb[2].mxu1  ;;  %v1415_v21 = vmul.f32 %v1123_v17, %v1123_v17 }
 0x13e   : > { %v1085_v18 = vpop.f32.mrb[3].mxu0  ;;  %v1126_v22 = vpop.f32.mrb[3].mxu1 }
 0x13f   : > { %v1428_v20 = vadd.f32 %v1413_v14, %v1412_v8  ;;  %v1392_v13 = vadd.f32 %v1391_v12, %v1121_v11  ;;  %v1390_v22 = vld [vmem:[#allocation2] sm:$0xff] }
 0x141   : > { %v1429_v23 = vadd.f32 %v1428_v20, %v1414_v16  ;;  %v1393_v24 = vadd.f32 %v1392_v13, %v1123_v17 }
 0x143   : > { %v1430_v25 = vadd.f32 %v1429_v23, %v1415_v21 }
 0x15b   : > { %v1162_v26 = vpop.f32.mrb[4].mxu0  ;;  %v1203_v30 = vpop.f32.mrb[4].mxu1 }
 0x15c   : > { %1378 = vst [vmem:[%s2034_s23 + $0x20] sm:$0xff] %v1162_v26  ;;  %v1394_v27 = vadd.f32 %v1393_v24, %v1162_v26  ;;  %v1416_v28 = vmul.f32 %v1162_v26, %v1162_v26  ;;  %v1164_v29 = vpop.f32.mrb[5].mxu0  ;;  %1380 = vst [vmem:[%s2034_s23 + $0x30] sm:$0xff] %v1203_v30  ;;  %v1205_v33 = vpop.f32.mrb[5].mxu1  ;;  %v1418_v36 = vmul.f32 %v1203_v30, %v1203_v30 }
 0x15d   : > { %1379 = vst [vmem:[%s2034_s23 + $0x28] sm:$0xff] %v1164_v29  ;;  %v1417_v31 = vmul.f32 %v1164_v29, %v1164_v29  ;;  %v1166_v32 = vpop.f32.mrb[6].mxu0  ;;  %1381 = vst [vmem:[%s2034_s23 + $0x38] sm:$0xff] %v1205_v33  ;;  %v1207_v38 = vpop.f32.mrb[6].mxu1  ;;  %v1419_v42 = vmul.f32 %v1205_v33, %v1205_v33 }
 0x15e   : > { %v1431_v34 = vadd.f32 %v1430_v25, %v1416_v28  ;;  %v1395_v35 = vadd.f32 %v1394_v27, %v1164_v29  ;;  %v1167_v37 = vpop.f32.mrb[7].mxu0  ;;  %v1208_v39 = vpop.f32.mrb[7].mxu1  ;;  %v1411_v25 = vld [vmem:[#allocation3] sm:$0xff]  ;;  %v1454_v28 = vstv (!%p1706_p6), %s1452_s19  ;;  %v1464_v38 = vld [vmem:[%s2265_s3] sm:$0xff] (!%p1706_p6) }
 0x15f   : > { %1765 = vrcp.f32 (!%p1706_p6), %v1454_v28 }
 0x160   : > { %v1432_v40 = vadd.f32 %v1431_v34, %v1417_v31  ;;  %v1396_v41 = vadd.f32 %v1395_v35, %v1203_v30 }
 0x162   : > { %v1433_v9 = vadd.f32 %v1432_v40, %v1418_v36  ;;  %v1397_v43 = vadd.f32 %v1396_v41, %v1205_v33  ;;  %v1467_v41 = vld [vmem:[%s2266_s4] sm:$0xff] (!%p1706_p6) }
 0x164   : > { %v1434_v44 = vadd.f32 %v1433_v9, %v1419_v42 }
 0x169   : > { %v1766_v31 = vpop.eup (!%p1706_p6), %1765 }
 0x17b   : > { %v1244_v45 = vpop.f32.mrb[8].mxu0  ;;  %v1285_v49 = vpop.f32.mrb[8].mxu1 }
 0x17c   : > { %1382 = vst [vmem:[%s2034_s23 + $0x40] sm:$0xff] %v1244_v45  ;;  %v1398_v46 = vadd.f32 %v1397_v43, %v1244_v45  ;;  %v1420_v47 = vmul.f32 %v1244_v45, %v1244_v45  ;;  %v1246_v48 = vpop.f32.mrb[9].mxu0  ;;  %1384 = vst [vmem:[%s2034_s23 + $0x50] sm:$0xff] %v1285_v49  ;;  %v1287_v52 = vpop.f32.mrb[9].mxu1  ;;  %v1422_v55 = vmul.f32 %v1285_v49, %v1285_v49 }
 0x17d   : > { %1383 = vst [vmem:[%s2034_s23 + $0x48] sm:$0xff] %v1246_v48  ;;  %v1421_v50 = vmul.f32 %v1246_v48, %v1246_v48  ;;  %v1248_v51 = vpop.f32.mrb[10].mxu0  ;;  %1385 = vst [vmem:[%s2034_s23 + $0x58] sm:$0xff] %v1287_v52  ;;  %v1289_v57 = vpop.f32.mrb[10].mxu1  ;;  %v1423_v61 = vmul.f32 %v1287_v52, %v1287_v52 }
 0x17e   : > { %v1435_v53 = vadd.f32 %v1434_v44, %v1420_v47  ;;  %v1399_v54 = vadd.f32 %v1398_v46, %v1246_v48  ;;  %v1249_v56 = vpop.f32.mrb[11].mxu0  ;;  %v1290_v58 = vpop.f32.mrb[11].mxu1 }
 0x180   : > { %v1436_v59 = vadd.f32 %v1435_v53, %v1421_v50  ;;  %v1400_v60 = vadd.f32 %v1399_v54, %v1285_v49 }
 0x182   : > { %v1437_v62 = vadd.f32 %v1436_v59, %v1422_v55  ;;  %v1401_v63 = vadd.f32 %v1400_v60, %v1287_v52 }
 0x184   : > { %v1438_v0 = vadd.f32 %v1437_v62, %v1423_v61 }
 0x19b   : > { %v1326_v1 = vpop.f32.mrb[12].mxu0  ;;  %v1367_v5 = vpop.f32.mrb[12].mxu1 }
 0x19c   : > { %1386 = vst [vmem:[%s2034_s23 + $0x60] sm:$0xff] %v1326_v1  ;;  %v1402_v2 = vadd.f32 %v1401_v63, %v1326_v1  ;;  %v1424_v3 = vmul.f32 %v1326_v1, %v1326_v1  ;;  %v1328_v4 = vpop.f32.mrb[13].mxu0  ;;  %1388 = vst [vmem:[%s2034_s23 + $0x70] sm:$0xff] %v1367_v5  ;;  %v1369_v8 = vpop.f32.mrb[13].mxu1  ;;  %v1426_v12 = vmul.f32 %v1367_v5, %v1367_v5 }
 0x19d   : > { %1387 = vst [vmem:[%s2034_s23 + $0x68] sm:$0xff] %v1328_v4  ;;  %v1425_v6 = vmul.f32 %v1328_v4, %v1328_v4  ;;  %v1330_v7 = vpop.f32.mrb[14].mxu0  ;;  %1389 = vst [vmem:[%s2034_s23 + $0x78] sm:$0xff] %v1369_v8  ;;  %v1371_v15 = vpop.f32.mrb[14].mxu1  ;;  %v1427_v20 = vmul.f32 %v1369_v8, %v1369_v8 }
 0x19e   : > { %v1439_v10 = vadd.f32 %v1438_v0, %v1424_v3  ;;  %v1403_v11 = vadd.f32 %v1402_v2, %v1328_v4  ;;  %v1331_v14 = vpop.f32.mrb[15].mxu0  ;;  %v1372_v16 = vpop.f32.mrb[15].mxu1 }
 0x1a0   : > { %v1404_v17 = vadd.f32 %v1403_v11, %v1367_v5  ;;  %v1440_v18 = vadd.f32 %v1439_v10, %v1425_v6 }
 0x1a2   : > { %v1405_v19 = vadd.f32 %v1404_v17, %v1369_v8  ;;  %v1441_v13 = vadd.f32 %v1440_v18, %v1426_v12 }
 0x1a4   : > { %1406 = vadd.xlane.f32.xlu0 %v1405_v19  ;;  %v1442_v21 = vadd.f32 %v1441_v13, %v1427_v20 }
 0x1a8   : > { %1443 = vadd.xlane.f32.xlu0 %v1442_v21 }
 0x231   : > { %v1407_v23 = vpop.xlane.xlu0 %1406 }
 0x232   : > { %v1408_v24 = vadd.f32 %v1407_v23, %v1390_v22  ;;  %1450 = sbr.rel (%p1706_p6) target bundleno = 602 (0x25a), region = 48 }
 0x234   : > { %1410 = vst.msk [vmem:[#allocation2] sm:$0xff] %vm1409_vm1, %v1408_v24 }
 0x235   : > { %v1444_v26 = vpop.xlane.xlu0 %1443 }
 0x236   : > { %v1445_v27 = vadd.f32 %v1444_v26, %v1411_v25 }
 0x238   : > { %1446 = vst.msk [vmem:[#allocation3] sm:$0xff] %vm1409_vm1, %v1445_v27 }
 0x23b   : > { %v1453_v29 = vld [vmem:[#allocation2] sm:$0xff] }
 0x23c   : > { %v1456_v32 = vmul.f32 %v1766_v31, %v1453_v29 }
 0x23e   : > { %v1459_v34 = vmul.f32 %v1456_v32, %v1456_v32 }
 0x23f   : > { %v1457_v30 = vld [vmem:[#allocation3] sm:$0xff] }
 0x240   : > { %v1458_v33 = vmul.f32 %v1766_v31, %v1457_v30 }
 0x242   : > { %v1460_v35 = vsub.f32 %v1458_v33, %v1459_v34 }
 0x244   : > { %v1461_v36 = vmax.f32 %v1460_v35, 0.0 }
 0x246   : > { %v1462_v37 = vadd.f32 1e-05, %v1461_v36 }
 0x248   : > { %1767 = vrsqrt.f32 %v1462_v37 }
 0x252   : > { %v1768_v39 = vpop.eup %1767 }
 0x253   : > { %v1465_v40 = vmul.f32 %v1768_v39, %v1464_v38 }
 0x255   : > { %1466 = vst.msk [vmem:[%s2268_s6] sm:$0xff] %vm1409_vm1, %v1465_v40  ;;  %v1468_v42 = vmul.f32 %v1465_v40, %v1456_v32 }
 0x257   : > { %v1469_v9 = vsub.f32 %v1467_v41, %v1468_v42 }
 0x259   : > { %1470 = vst.msk [vmem:[%s2269_s7] sm:$0xff] %vm1409_vm1, %v1469_v9 }
 0x25a PF: > { %s1713_s21 = sshll.u32 %s1938_s0, 11  ;;  %s1486_s19 = sshll.u32 %s2034_s23, 4  ;;  %s1487_s19 = int_to_ptr.vmem [resolvable:$true] %s1486_s19 }
 0x25b   : > { %s2223_s25 = scalar_lea.hbm %s2267_s5, %s1713_s21  ;;  %s1472_s20 = scalar_lea.sflag [#allocation8], %s2023_s12 }
 0x25c   : > { %s1799_s22 = scalar_lea.vmem %s1487_s19, 2048  ;;  %p2277_p13 = scmp.ne.s32.totalorder %s2273_s14, 0 }
 0x25d   : > { %p1800_p12 = scmp.ne.s32.totalorder %s1487_s19, %s1799_s22  ;;  %s1873_s30 = smov [#allocation9]  }
 0x25e   : > { %s1803_s9 = sshll.u32 %s1873_s30, 4  ;;  %s1804_s9 = int_to_ptr.vmem [resolvable:$false] %s1803_s9 }
 0x25f   : > { %p1801_p4 = pnand %p1800_p12, %p2277_p13  ;;  %s1805_s10 = scalar_lea.vmem %s1804_s9, 4096 }
 0x260   : > { %p1806_p1 = scmp.lt.s32.totalorder %s1487_s19, %s1804_s9  ;;  %p1807_p3 = scmp.lt.s32.totalorder %s1805_s10, %s1799_s22 }
 0x261   : > { %p1802_p10 = pneg %p1801_p4 }
 0x262   : > { %p1808_p5 = por %p1807_p3, %p1806_p1 }
 0x264   : > { %p1809_p7 = pnand %p1808_p5, %p1802_p10 }
 0x266   : > { %1812 = shalt.err (!%p1809_p7)
}
 0x267   : > { %s1813_s0 = scalar_lea.hbm %s2223_s25, 2048  ;;  %s1817_s17 = scalar_lea.hbm %s2267_s5, 4096 }
 0x268   : > { %p1814_p8 = scmp.ne.s32.totalorder %s2223_s25, %s1813_s0  ;;  %p1818_p2 = scmp.lt.u32.totalorder %s2223_s25, %s2267_s5 }
 0x269   : > { %p1819_p11 = scmp.lt.u32.totalorder %s1817_s17, %s1813_s0  ;;  %p1821_p12 = scmp.lt.u32.totalorder %s1813_s0, %s2223_s25 }
 0x26a   : > { %p1815_p9 = pnand %p1814_p8, %p2277_p13 }
 0x26b   : > { %p1820_p6 = por %p1819_p11, %p1818_p2 }
 0x26c   : > { %p1816_p0 = pneg %p1815_p9 }
 0x26d   : > { %p1822_p4 = por %p1821_p12, %p1820_p6 }
 0x26f   : > { %p1823_p10 = pnand %p1822_p4, %p1816_p0 }
 0x271   : > { %1826 = shalt.err (!%p1823_p10)
}
 0x272   : > { %1716 = dma.vmem_to_hbm [thread:$0]  (%p2277_p13), %s1487_s19, 2048, %s2223_s25, %s1472_s20  }
 0x273 PF: > { %s1510_s21 = sand.u32 1, %s1853_s26   ;;  %p2278_p1 = scmp.ne.s32.totalorder %s2274_s15, 0 }
 0x274   : > { %p2279_p3 = scmp.ge.s32.totalorder %s1865_s29, 2  ;;  %s1511_s13 = scalar_lea.sflag [#allocation8], %s1510_s21 }
 0x276   : > { %p1723_p5 = pnand %p2279_p3, %p2278_p1 }
 0x278   : > { %1848 = dma.done.wait (!%p1723_p5), %s1511_s13, 2048  }
 0x279   : > { %1850 = vsyncadd (!%p1723_p5), %s1511_s13, 4294965248  ;;  %p22_p7 = scmp.ge.s32.totalorder %s1942_s8, 4   ;;  %s2280_s26 = smov %s1857_s27 }
 0x27a   : > { %s2281_s27 = smov %s1861_s28  ;;  %s2282_s28 = smov %s1954_s11 }
 0x27b   : > { %s2283_s29 = smov %s1942_s8  ;;  %24 = sbr.rel (!%p22_p7) target bundleno = 7 (0x7), region = 105 }
 0x282   :  { %1516 = vsyncpa [#allocation7], 1 }
 0x283   :  { %1518 = vsyncpa [#allocation7 + $0x1], 1 }
 0x284   :  { %1519 = vsyncpa [#allocation8], 1 }
 0x285   :  { %1521 = vsyncpa [#allocation8 + $0x1], 1 }

</bundles_post_ra>
